<compile_context>
chip_gen: v5e
topology: v5e:2x2
jax: 0.10.0
libtpu: 0.0.40
codegen_flags: <defaults>
</compile_context>

<pallas_src>
import functools

import jax
import jax.numpy as jnp
from jax.experimental import pallas as pl
from jax.experimental.pallas import tpu as pltpu


# ----------------------------------------------------------------------------
# Pallas kernel: one decode time step for one batch tile per grid iteration.
# ----------------------------------------------------------------------------
def _decoder_step_kernel(
    att_gate_ref,   # (1, bt, 4H)  streamed: emb_t @ W_e + meanf @ W_m + b_att
    att1_ref,       # (bt, N, A)   resident: proj @ Wf + bf
    feat_ref,       # (bt, N, P)   resident: projected features
    w_att_rec_ref,  # (2H, 4H)     stacked [W_ih(h_lang) ; W_hh]   (f32 or bf16)
    wh_ref,         # (H, A)       hidden_att weight               (f32 or bf16)
    bh_ref,         # (1, A)       hidden_att bias
    wa_ref,         # (1, A)       full_att weight as a row (VPU reduce, no (A,1) matmul)
    w_lang_ref,     # (P+2H, 4H)   stacked [W_ih(ctx) ; W_ih(h_att) ; W_hh]  (f32 or bf16)
    b_lang_ref,     # (1, 4H)      lang-LSTM fused bias (b_ih + b_hh)
    out_ref,        # (1, bt, H)   h_lang for this step (logits computed outside)
    hh_ref,         # (bt, 2H)     scratch: [h_lang | h_att], persists over t
    c_att_ref,      # (bt, H)      scratch
    c_lang_ref,     # (bt, H)      scratch
    lang_in_ref,    # (bt, P+2H)   scratch: staging for the merged lang-LSTM matmul
    *,
    approx_softmax: bool,
):
    t = pl.program_id(1)
    f32 = jnp.float32
    H = c_att_ref.shape[1]
    P = feat_ref.shape[2]
    mm_dtype = w_att_rec_ref.dtype          # bf16 when fast_math, else f32

    @pl.when(t == 0)
    def _init_states():
        hh_ref[...] = jnp.zeros_like(hh_ref)
        c_att_ref[...] = jnp.zeros_like(c_att_ref)
        c_lang_ref[...] = jnp.zeros_like(c_lang_ref)

    hh_prev = hh_ref[...]                   # [h_lang_prev | h_att_prev]
    h_lang_prev = hh_prev[:, 0:H]
    c_att_prev = c_att_ref[...]
    c_lang_prev = c_lang_ref[...]

    # --- attention (top-down) LSTM cell: merged recurrent matmul + hoisted input gate ---
    gates_a = (
        jnp.dot(hh_prev.astype(mm_dtype), w_att_rec_ref[...], preferred_element_type=f32)
        + att_gate_ref[0]
    )
    i_a = jax.nn.sigmoid(gates_a[:, 0:H])
    f_a = jax.nn.sigmoid(gates_a[:, H:2 * H])
    g_a = jnp.tanh(gates_a[:, 2 * H:3 * H])
    o_a = jax.nn.sigmoid(gates_a[:, 3 * H:4 * H])
    c_att = f_a * c_att_prev + i_a * g_a
    h_att = o_a * jnp.tanh(c_att)
    c_att_ref[...] = c_att

    # --- visual attention over regions (whole batch tile at once) ---
    att2 = (jnp.dot(h_att.astype(mm_dtype), wh_ref[...], preferred_element_type=f32)
            + bh_ref[...])                                                        # (bt, A)
    att = jnp.tanh(att1_ref[...] + att2[:, None, :])                              # (bt, N, A)
    # A -> 1 projection as a VPU multiply + lane reduction (no 1-lane MXU matmul).
    e = jnp.sum(att * wa_ref[...], axis=-1)                                       # (bt, N)
    # full_att bias `ba` omitted: softmax is shift-invariant and `e` never leaves the kernel.
    m = jnp.max(e, axis=-1, keepdims=True)
    pexp = jnp.exp(e - m)
    denom = jnp.sum(pexp, axis=-1, keepdims=True)
    alpha = pexp * pl.reciprocal(denom, approx=approx_softmax)                    # (bt, N)
    context = jnp.sum(feat_ref[...] * alpha[:, :, None], axis=1)                  # (bt, P)

    # --- language LSTM cell: single merged matmul via staging scratch ---
    lang_in_ref[:, 0:P] = context
    lang_in_ref[:, P:P + H] = h_att
    lang_in_ref[:, P + H:P + 2 * H] = h_lang_prev
    gates_l = (
        jnp.dot(lang_in_ref[...].astype(mm_dtype), w_lang_ref[...], preferred_element_type=f32)
        + b_lang_ref[...]
    )
    i_l = jax.nn.sigmoid(gates_l[:, 0:H])
    f_l = jax.nn.sigmoid(gates_l[:, H:2 * H])
    g_l = jnp.tanh(gates_l[:, 2 * H:3 * H])
    o_l = jax.nn.sigmoid(gates_l[:, 3 * H:4 * H])
    c_lang = f_l * c_lang_prev + i_l * g_l
    h_lang = o_l * jnp.tanh(c_lang)
    c_lang_ref[...] = c_lang
    hh_ref[:, 0:H] = h_lang
    hh_ref[:, H:2 * H] = h_att

    out_ref[0] = h_lang.astype(out_ref.dtype)


# ----------------------------------------------------------------------------
# Wrapper: hoist time-invariant work + vocab FC to XLA, run the recurrent kernel.
# ----------------------------------------------------------------------------
def updown_captioner_text(features, captions, feature_mask, p, *,
                          batch_tile=None, fast_math=True):
    """features: (B, N, feature_dim) f32; captions: (B, T) int32; feature_mask: (B, N) f32."""
    B, N, _ = features.shape
    T = captions.shape[1]
    P = p["wp"].shape[1]
    A = p["wf"].shape[1]
    H = p["whh_att"].shape[0]
    V = p["wfc"].shape[1]
    H4 = 4 * H

    bt = B if batch_tile is None else batch_tile      # production: pick bt a multiple of 8
    assert B % bt == 0
    nb = B // bt

    f32 = jnp.float32
    mm_dtype = jnp.bfloat16 if fast_math else f32     # MXU operand dtype (f32 accumulation)

    # -- one-shot, time-invariant precompute (hoisted out of the recurrent kernel) --
    proj = (features @ p["wp"] + p["bp"]).astype(f32)             # (B, N, P)  feature_proj
    valid = proj * feature_mask[:, :, None]
    counts = jnp.sum(feature_mask, axis=1, keepdims=True)
    meanf = jnp.sum(valid, axis=1) / counts                       # (B, P)
    att1 = (proj @ p["wf"] + p["bf"]).astype(f32)                 # (B, N, A)  feature_att
    # TODO(synk): embedding gather is a data-dependent lookup; done with XLA take here.
    emb_tbe = jnp.transpose(p["embed"][captions], (1, 0, 2))      # (T, B, E)
    # Hoisted att-LSTM input-gate terms: per-step embedding gate + time-invariant meanf gate + bias.
    att_gate = (jnp.einsum("tbe,eg->tbg", emb_tbe, p["wih_att_e"])
                + (meanf @ p["wih_att_m"] + p["b_att"])[None]).astype(f32)   # (T, B, 4H)

    # Pre-stacked recurrent weights (merged in-kernel matmuls, no concats inside the kernel).
    w_att_rec = jnp.concatenate([p["wih_att_h"], p["whh_att"]], axis=0).astype(mm_dtype)
    w_lang = jnp.concatenate([p["wih_lang_c"], p["wih_lang_h"], p["whh_lang"]],
                             axis=0).astype(mm_dtype)
    wh = p["wh"].astype(mm_dtype)
    row = lambda v: v.reshape(1, -1).astype(f32)

    const2 = lambda b, t: (0, 0)
    single = pl.Buffered(1)                  # resident blocks: no double buffering

    grid_spec = pltpu.PrefetchScalarGridSpec(
        num_scalar_prefetch=0,
        grid=(nb, T),                        # (parallel batch tiles, sequential recurrence)
        in_specs=[
            pl.BlockSpec((1, bt, H4), lambda b, t: (t, b, 0)),                  # streamed gate
            pl.BlockSpec((bt, N, A), lambda b, t: (b, 0, 0), pipeline_mode=single),
            pl.BlockSpec((bt, N, P), lambda b, t: (b, 0, 0), pipeline_mode=single),
            pl.BlockSpec((2 * H, H4), const2, pipeline_mode=single),
            pl.BlockSpec((H, A), const2, pipeline_mode=single),
            pl.BlockSpec((1, A), const2, pipeline_mode=single),
            pl.BlockSpec((1, A), const2, pipeline_mode=single),
            pl.BlockSpec((P + 2 * H, H4), const2, pipeline_mode=single),
            pl.BlockSpec((1, H4), const2, pipeline_mode=single),
        ],
        out_specs=pl.BlockSpec((1, bt, H), lambda b, t: (t, b, 0)),             # h_lang slab
        scratch_shapes=[
            pltpu.VMEM((bt, 2 * H), f32),        # [h_lang | h_att]
            pltpu.VMEM((bt, H), f32),            # c_att
            pltpu.VMEM((bt, H), f32),            # c_lang
            pltpu.VMEM((bt, P + 2 * H), f32),    # lang-LSTM input staging
        ],
    )

    # Explicit scoped-VMEM budget sized from the working set (review item).
    witm = jnp.dtype(mm_dtype).itemsize
    working_set = (
        2 * bt * H4 * 4                                   # streamed gate (double-buffered)
        + bt * N * A * 4 + bt * N * P * 4                 # resident region tensors
        + (2 * H * H4 + H * A + (P + 2 * H) * H4) * witm  # resident weights
        + (2 * A + H4) * 4                                # biases / wa row
        + 2 * bt * H * 4                                  # output block (double-buffered)
        + bt * (6 * H + P) * 4                            # scratch
    )
    vmem_limit = int(min(max(2 * working_set, 8 * 1024 * 1024), 64 * 1024 * 1024))

    kernel = functools.partial(_decoder_step_kernel, approx_softmax=fast_math)
    h_tbh = pl.pallas_call(
        kernel,
        out_shape=jax.ShapeDtypeStruct((T, B, H), f32),
        grid_spec=grid_spec,
        compiler_params=pltpu.CompilerParams(
            dimension_semantics=("parallel", "arbitrary"),
            vmem_limit_bytes=vmem_limit,
        ),
    )(att_gate, att1, proj, w_att_rec, wh, row(p["bh"]), row(p["wa"]),
      w_lang, row(p["b_lang"]))

    # Vocab FC hoisted out of the serial loop: one big (T*B, H) @ (H, V) matmul.
    logits_btv = jnp.einsum("tbh,hv->btv", h_tbh, p["wfc"]) + p["bfc"]           # (B, T, V)
    return logits_btv


# ----------------------------------------------------------------------------
# Deterministic synthetic parameters (weights stored transposed: (in_dim, out_dim)).
# ----------------------------------------------------------------------------
def init_params(key, vocab_size, feature_dim, proj_dim, embed_dim, hidden_dim, attention_dim):
    ks = iter(jax.random.split(key, 24))

    def u(shape, fan_in):
        bound = 1.0 / jnp.sqrt(fan_in)
        return jax.random.uniform(next(ks), shape, jnp.float32, -bound, bound)

    H4 = 4 * hidden_dim
    att_in = hidden_dim + proj_dim + embed_dim
    lang_in = proj_dim + hidden_dim

    embed = u((vocab_size, embed_dim), embed_dim).at[0].set(0.0)  # padding_idx=0

    return dict(
        embed=embed,
        wp=u((feature_dim, proj_dim), feature_dim), bp=u((proj_dim,), feature_dim),
        wf=u((proj_dim, attention_dim), proj_dim), bf=u((attention_dim,), proj_dim),
        wh=u((hidden_dim, attention_dim), hidden_dim), bh=u((attention_dim,), hidden_dim),
        wa=u((attention_dim,), attention_dim), ba=u((), attention_dim),
        wih_att_h=u((hidden_dim, H4), att_in), wih_att_m=u((proj_dim, H4), att_in),
        wih_att_e=u((embed_dim, H4), att_in), whh_att=u((hidden_dim, H4), hidden_dim),
        b_att=u((H4,), att_in),
        wih_lang_c=u((proj_dim, H4), lang_in), wih_lang_h=u((hidden_dim, H4), lang_in),
        whh_lang=u((hidden_dim, H4), hidden_dim), b_lang=u((H4,), lang_in),
        wfc=u((hidden_dim, vocab_size), hidden_dim), bfc=u((vocab_size,), hidden_dim),
    )


# ----------------------------------------------------------------------------
# Pure-JAX reference (mirrors the PyTorch forward exactly, including the ba bias).
# ----------------------------------------------------------------------------
def _lstm_cell_ref(x, h, c, w_ih, w_hh, b):
    gates = x @ w_ih + h @ w_hh + b
    i, f, g, o = jnp.split(gates, 4, axis=1)
    c_new = jax.nn.sigmoid(f) * c + jax.nn.sigmoid(i) * jnp.tanh(g)
    h_new = jax.nn.sigmoid(o) * jnp.tanh(c_new)
    return h_new, c_new


def reference_forward(features, captions, feature_mask, p):
    B = features.shape[0]
    T = captions.shape[1]
    H = p["whh_att"].shape[0]

    proj = features @ p["wp"] + p["bp"]
    valid = proj * feature_mask[:, :, None]
    counts = jnp.sum(feature_mask, axis=1, keepdims=True)
    meanf = jnp.sum(valid, axis=1) / counts
    emb = p["embed"][captions]

    w_ih_att = jnp.concatenate([p["wih_att_h"], p["wih_att_m"], p["wih_att_e"]], axis=0)
    w_ih_lang = jnp.concatenate([p["wih_lang_c"], p["wih_lang_h"]], axis=0)

    h_att = jnp.zeros((B, H), jnp.float32)
    c_att = jnp.zeros((B, H), jnp.float32)
    h_lang = jnp.zeros((B, H), jnp.float32)
    c_lang = jnp.zeros((B, H), jnp.float32)

    outs = []
    for t in range(T):
        x = jnp.concatenate([h_lang, meanf, emb[:, t, :]], axis=1)
        h_att, c_att = _lstm_cell_ref(x, h_att, c_att, w_ih_att, p["whh_att"], p["b_att"])

        att1 = proj @ p["wf"] + p["bf"]
        att2 = h_att @ p["wh"] + p["bh"]
        att = jnp.tanh(att1 + att2[:, None, :])
        e = (att @ p["wa"][:, None])[..., 0] + p["ba"]
        alpha = jax.nn.softmax(e, axis=1)
        context = jnp.sum(proj * alpha[:, :, None], axis=1)

        x2 = jnp.concatenate([context, h_att], axis=1)
        h_lang, c_lang = _lstm_cell_ref(x2, h_lang, c_lang, w_ih_lang, p["whh_lang"], p["b_lang"])
        outs.append(h_lang @ p["wfc"] + p["bfc"])
    return jnp.stack(outs, axis=1)


if __name__ == "__main__":
    # Small shapes consistent with the module (proj/hidden/attention dims scaled down).
    B, N, T = 2, 16, 8
    feature_dim, proj_dim, embed_dim, hidden_dim, attention_dim = 32, 64, 32, 32, 32
    vocab_size = 128

    key = jax.random.PRNGKey(0)
    k_feat, k_cap, k_par = jax.random.split(key, 3)
    features = jax.random.normal(k_feat, (B, N, feature_dim), jnp.float32)
    captions = jax.random.randint(k_cap, (B, T), 1, vocab_size).astype(jnp.int32)
    captions = captions.at[:, -1].set(0)  # exercise padding_idx=0
    lengths = jnp.array([N, 10], dtype=jnp.int32)
    feature_mask = (jnp.arange(N)[None, :] < lengths[:, None]).astype(jnp.float32)

    params = init_params(k_par, vocab_size, feature_dim, proj_dim, embed_dim,
                         hidden_dim, attention_dim)

    ref = reference_forward(features, captions, feature_mask, params)

    # Exact-math path (f32 MXU operands, exact softmax reciprocal): tight correctness check.
    out = updown_captioner_text(features, captions, feature_mask, params, fast_math=False)
    jax.block_until_ready(out)
    assert out.shape == (B, T, vocab_size)
    err = float(jnp.max(jnp.abs(out - ref)))
    assert jnp.allclose(out, ref, atol=5e-4, rtol=5e-4), err

    # Fast-math path (bf16 MXU operands + approx softmax reciprocal): loose sanity check.
    out_fast = updown_captioner_text(features, captions, feature_mask, params, fast_math=True)
    jax.block_until_ready(out_fast)
    assert out_fast.shape == (B, T, vocab_size)
    assert bool(jnp.all(jnp.isfinite(out_fast)))
    fast_err = float(jnp.max(jnp.abs(out_fast - ref)))
    assert fast_err < 0.5, fast_err

    print("KERNEL_OK")
</pallas_src>

<mosaic_0001>
module attributes {stable_mosaic.version = 11 : i64} {
  func.func @_decoder_step_kernel(%arg0: i32, %arg1: i32, %arg2: memref<1x2x128xf32, #tpu.memory_space<vmem>>, %arg3: memref<2x16x32xf32, #tpu.memory_space<vmem>>, %arg4: memref<2x16x64xf32, #tpu.memory_space<vmem>>, %arg5: memref<64x128xf32, #tpu.memory_space<vmem>>, %arg6: memref<32x32xf32, #tpu.memory_space<vmem>>, %arg7: memref<1x32xf32, #tpu.memory_space<vmem>>, %arg8: memref<1x32xf32, #tpu.memory_space<vmem>>, %arg9: memref<128x128xf32, #tpu.memory_space<vmem>>, %arg10: memref<1x128xf32, #tpu.memory_space<vmem>>, %arg11: memref<1x2x32xf32, #tpu.memory_space<vmem>>, %arg12: memref<2x64xf32, #tpu.memory_space<vmem>>, %arg13: memref<2x32xf32, #tpu.memory_space<vmem>>, %arg14: memref<2x32xf32, #tpu.memory_space<vmem>>, %arg15: memref<2x128xf32, #tpu.memory_space<vmem>>) attributes {dimension_semantics = [#tpu.dimension_semantics<parallel>, #tpu.dimension_semantics<arbitrary>], iteration_bounds = array<i64: 1, 8>, scalar_prefetch = 0 : i64, scratch_operands = 4 : i64, tpu.core_type = #tpu.core_type<tc>, window_params = [{transform_indices = @transform_0, window_bounds = array<i64: 1, 2, 128>}, {pipeline_mode = #tpu.pipeline_mode<synchronous>, transform_indices = @transform_1, window_bounds = array<i64: 2, 16, 32>}, {pipeline_mode = #tpu.pipeline_mode<synchronous>, transform_indices = @transform_2, window_bounds = array<i64: 2, 16, 64>}, {pipeline_mode = #tpu.pipeline_mode<synchronous>, transform_indices = @transform_3, window_bounds = array<i64: 64, 128>}, {pipeline_mode = #tpu.pipeline_mode<synchronous>, transform_indices = @transform_4, window_bounds = array<i64: 32, 32>}, {pipeline_mode = #tpu.pipeline_mode<synchronous>, transform_indices = @transform_5, window_bounds = array<i64: 1, 32>}, {pipeline_mode = #tpu.pipeline_mode<synchronous>, transform_indices = @transform_6, window_bounds = array<i64: 1, 32>}, {pipeline_mode = #tpu.pipeline_mode<synchronous>, transform_indices = @transform_7, window_bounds = array<i64: 128, 128>}, {pipeline_mode = #tpu.pipeline_mode<synchronous>, transform_indices = @transform_8, window_bounds = array<i64: 1, 128>}, {transform_indices = @transform_9, window_bounds = array<i64: 1, 2, 32>}]} {
    %c0_i32 = arith.constant 0 : i32
    %0 = arith.cmpi eq, %arg1, %c0_i32 : i32
    %1 = arith.extui %0 : i1 to i32
    %c0_i32_0 = arith.constant 0 : i32
    %2 = arith.cmpi ne, %1, %c0_i32_0 : i32
    scf.if %2 {
      %cst_55 = arith.constant 0.000000e+00 : f32
      %108 = vector.broadcast %cst_55 : f32 to vector<2x64xf32>
      %c0_56 = arith.constant 0 : index
      %c0_57 = arith.constant 0 : index
      %109 = vector.load %arg12[%c0_56, %c0_57] : memref<2x64xf32, #tpu.memory_space<vmem>>, vector<2x64xf32>
      tpu.vector_store %arg12[%c0_56, %c0_57], %108 {strides = array<i32>} : memref<2x64xf32, #tpu.memory_space<vmem>>, vector<2x64xf32>,
      %cst_58 = arith.constant 0.000000e+00 : f32
      %110 = vector.broadcast %cst_58 : f32 to vector<2x32xf32>
      %c0_59 = arith.constant 0 : index
      %c0_60 = arith.constant 0 : index
      %111 = vector.load %arg13[%c0_59, %c0_60] : memref<2x32xf32, #tpu.memory_space<vmem>>, vector<2x32xf32>
      tpu.vector_store %arg13[%c0_59, %c0_60], %110 {strides = array<i32>} : memref<2x32xf32, #tpu.memory_space<vmem>>, vector<2x32xf32>,
      %cst_61 = arith.constant 0.000000e+00 : f32
      %112 = vector.broadcast %cst_61 : f32 to vector<2x32xf32>
      %c0_62 = arith.constant 0 : index
      %c0_63 = arith.constant 0 : index
      %113 = vector.load %arg14[%c0_62, %c0_63] : memref<2x32xf32, #tpu.memory_space<vmem>>, vector<2x32xf32>
      tpu.vector_store %arg14[%c0_62, %c0_63], %112 {strides = array<i32>} : memref<2x32xf32, #tpu.memory_space<vmem>>, vector<2x32xf32>,
    } else {
    }
    %c0 = arith.constant 0 : index
    %c0_1 = arith.constant 0 : index
    %3 = vector.load %arg12[%c0, %c0_1] : memref<2x64xf32, #tpu.memory_space<vmem>>, vector<2x64xf32>
    %4 = vector.extract_strided_slice %3 {offsets = [0, 0], sizes = [2, 32], strides = [1, 1]} : vector<2x64xf32> to vector<2x32xf32>
    %c0_2 = arith.constant 0 : index
    %c0_3 = arith.constant 0 : index
    %5 = vector.load %arg13[%c0_2, %c0_3] : memref<2x32xf32, #tpu.memory_space<vmem>>, vector<2x32xf32>
    %c0_4 = arith.constant 0 : index
    %c0_5 = arith.constant 0 : index
    %6 = vector.load %arg14[%c0_4, %c0_5] : memref<2x32xf32, #tpu.memory_space<vmem>>, vector<2x32xf32>
    %c0_6 = arith.constant 0 : index
    %c0_7 = arith.constant 0 : index
    %7 = vector.load %arg5[%c0_6, %c0_7] : memref<64x128xf32, #tpu.memory_space<vmem>>, vector<64x128xf32>
    %cst = arith.constant dense<0.000000e+00> : vector<2x128xf32>
    %8 = tpu.matmul %3, %7, %cst {dimension_numbers = #tpu.dot_dimension_numbers<[1], [0], [0], [1], [0, 0, 1, 1], [], []>} : vector<2x64xf32>, vector<64x128xf32>, vector<2x128xf32> -> vector<2x128xf32>
    %c0_8 = arith.constant 0 : index
    %c0_9 = arith.constant 0 : index
    %c0_10 = arith.constant 0 : index
    %9 = vector.load %arg2[%c0_8, %c0_9, %c0_10] : memref<1x2x128xf32, #tpu.memory_space<vmem>>, vector<1x2x128xf32>
    %10 = vector.shape_cast %9 : vector<1x2x128xf32> to vector<2x128xf32>
    %11 = arith.addf %8, %10 : vector<2x128xf32>
    %12 = vector.extract_strided_slice %11 {offsets = [0, 0], sizes = [2, 32], strides = [1, 1]} : vector<2x128xf32> to vector<2x32xf32>
    %13 = arith.negf %12 : vector<2x32xf32>
    %14 = math.exp %13 : vector<2x32xf32>
    %cst_11 = arith.constant 1.000000e+00 : f32
    %15 = vector.broadcast %cst_11 : f32 to vector<2x32xf32>
    %16 = arith.addf %15, %14 : vector<2x32xf32>
    %17 = arith.divf %15, %16 : vector<2x32xf32>
    %18 = vector.extract_strided_slice %11 {offsets = [0, 32], sizes = [2, 32], strides = [1, 1]} : vector<2x128xf32> to vector<2x32xf32>
    %19 = arith.negf %18 : vector<2x32xf32>
    %20 = math.exp %19 : vector<2x32xf32>
    %cst_12 = arith.constant 1.000000e+00 : f32
    %21 = vector.broadcast %cst_12 : f32 to vector<2x32xf32>
    %22 = arith.addf %21, %20 : vector<2x32xf32>
    %23 = arith.divf %21, %22 : vector<2x32xf32>
    %24 = vector.extract_strided_slice %11 {offsets = [0, 64], sizes = [2, 32], strides = [1, 1]} : vector<2x128xf32> to vector<2x32xf32>
    %25 = math.tanh %24 : vector<2x32xf32>
    %26 = vector.extract_strided_slice %11 {offsets = [0, 96], sizes = [2, 32], strides = [1, 1]} : vector<2x128xf32> to vector<2x32xf32>
    %27 = arith.negf %26 : vector<2x32xf32>
    %28 = math.exp %27 : vector<2x32xf32>
    %cst_13 = arith.constant 1.000000e+00 : f32
    %29 = vector.broadcast %cst_13 : f32 to vector<2x32xf32>
    %30 = arith.addf %29, %28 : vector<2x32xf32>
    %31 = arith.divf %29, %30 : vector<2x32xf32>
    %32 = arith.mulf %23, %5 : vector<2x32xf32>
    %33 = arith.mulf %17, %25 : vector<2x32xf32>
    %34 = arith.addf %32, %33 : vector<2x32xf32>
    %35 = math.tanh %34 : vector<2x32xf32>
    %36 = arith.mulf %31, %35 : vector<2x32xf32>
    %c0_14 = arith.constant 0 : index
    %c0_15 = arith.constant 0 : index
    %37 = vector.load %arg13[%c0_14, %c0_15] : memref<2x32xf32, #tpu.memory_space<vmem>>, vector<2x32xf32>
    tpu.vector_store %arg13[%c0_14, %c0_15], %34 {strides = array<i32>} : memref<2x32xf32, #tpu.memory_space<vmem>>, vector<2x32xf32>,
    %c0_16 = arith.constant 0 : index
    %c0_17 = arith.constant 0 : index
    %38 = vector.load %arg6[%c0_16, %c0_17] : memref<32x32xf32, #tpu.memory_space<vmem>>, vector<32x32xf32>
    %cst_18 = arith.constant dense<0.000000e+00> : vector<2x32xf32>
    %39 = tpu.matmul %36, %38, %cst_18 {dimension_numbers = #tpu.dot_dimension_numbers<[1], [0], [0], [1], [0, 0, 1, 1], [], []>} : vector<2x32xf32>, vector<32x32xf32>, vector<2x32xf32> -> vector<2x32xf32>
    %c0_19 = arith.constant 0 : index
    %c0_20 = arith.constant 0 : index
    %40 = vector.load %arg7[%c0_19, %c0_20] : memref<1x32xf32, #tpu.memory_space<vmem>>, vector<1x32xf32>
    %41 = vector.broadcast %40 : vector<1x32xf32> to vector<2x32xf32>
    %42 = arith.addf %39, %41 : vector<2x32xf32>
    %c0_21 = arith.constant 0 : index
    %c0_22 = arith.constant 0 : index
    %c0_23 = arith.constant 0 : index
    %43 = vector.load %arg3[%c0_21, %c0_22, %c0_23] : memref<2x16x32xf32, #tpu.memory_space<vmem>>, vector<2x16x32xf32>
    %44 = vector.shape_cast %42 : vector<2x32xf32> to vector<2x1x32xf32>
    %45 = vector.broadcast %44 : vector<2x1x32xf32> to vector<2x16x32xf32>
    %46 = arith.addf %43, %45 : vector<2x16x32xf32>
    %47 = math.tanh %46 : vector<2x16x32xf32>
    %c0_24 = arith.constant 0 : index
    %c0_25 = arith.constant 0 : index
    %48 = vector.load %arg8[%c0_24, %c0_25] : memref<1x32xf32, #tpu.memory_space<vmem>>, vector<1x32xf32>
    %49 = vector.shape_cast %48 : vector<1x32xf32> to vector<1x1x32xf32>
    %50 = vector.broadcast %49 : vector<1x1x32xf32> to vector<2x16x32xf32>
    %51 = arith.mulf %47, %50 : vector<2x16x32xf32>
    %cst_26 = arith.constant dense<0.000000e+00> : vector<2x16xf32>
    %52 = vector.multi_reduction <add>, %51, %cst_26 [2] : vector<2x16x32xf32> to vector<2x16xf32>
    %cst_27 = arith.constant dense<0xFF800000> : vector<2xf32>
    %53 = vector.multi_reduction <maximumf>, %52, %cst_27 [1] : vector<2x16xf32> to vector<2xf32>
    %54 = vector.shape_cast %53 : vector<2xf32> to vector<2x1xf32>
    %55 = vector.broadcast %54 : vector<2x1xf32> to vector<2x16xf32>
    %56 = arith.subf %52, %55 : vector<2x16xf32>
    %57 = math.exp %56 : vector<2x16xf32>
    %cst_28 = arith.constant dense<0.000000e+00> : vector<2xf32>
    %58 = vector.multi_reduction <add>, %57, %cst_28 [1] : vector<2x16xf32> to vector<2xf32>
    %59 = vector.shape_cast %58 : vector<2xf32> to vector<2x1xf32>
    %60 = tpu.reciprocal %59 : vector<2x1xf32> -> vector<2x1xf32>
    %61 = vector.broadcast %60 : vector<2x1xf32> to vector<2x16xf32>
    %62 = arith.mulf %57, %61 : vector<2x16xf32>
    %c0_29 = arith.constant 0 : index
    %c0_30 = arith.constant 0 : index
    %c0_31 = arith.constant 0 : index
    %63 = vector.load %arg4[%c0_29, %c0_30, %c0_31] : memref<2x16x64xf32, #tpu.memory_space<vmem>>, vector<2x16x64xf32>
    %64 = vector.shape_cast %62 : vector<2x16xf32> to vector<2x16x1xf32>
    %65 = vector.broadcast %64 : vector<2x16x1xf32> to vector<2x16x64xf32>
    %66 = arith.mulf %63, %65 : vector<2x16x64xf32>
    %cst_32 = arith.constant dense<0.000000e+00> : vector<2x64xf32>
    %67 = vector.multi_reduction <add>, %66, %cst_32 [1] : vector<2x16x64xf32> to vector<2x64xf32>
    %c0_33 = arith.constant 0 : index
    %c0_34 = arith.constant 0 : index
    %68 = vector.load %arg15[%c0_33, %c0_34] : memref<2x128xf32, #tpu.memory_space<vmem>>, vector<2x64xf32>
    tpu.vector_store %arg15[%c0_33, %c0_34], %67 {strides = array<i32>} : memref<2x128xf32, #tpu.memory_space<vmem>>, vector<2x64xf32>,
    %c0_35 = arith.constant 0 : index
    %c64 = arith.constant 64 : index
    %69 = vector.load %arg15[%c0_35, %c64] : memref<2x128xf32, #tpu.memory_space<vmem>>, vector<2x32xf32>
    tpu.vector_store %arg15[%c0_35, %c64], %36 {strides = array<i32>} : memref<2x128xf32, #tpu.memory_space<vmem>>, vector<2x32xf32>,
    %c0_36 = arith.constant 0 : index
    %c96 = arith.constant 96 : index
    %70 = vector.load %arg15[%c0_36, %c96] : memref<2x128xf32, #tpu.memory_space<vmem>>, vector<2x32xf32>
    tpu.vector_store %arg15[%c0_36, %c96], %4 {strides = array<i32>} : memref<2x128xf32, #tpu.memory_space<vmem>>, vector<2x32xf32>,
    %c0_37 = arith.constant 0 : index
    %c0_38 = arith.constant 0 : index
    %71 = vector.load %arg15[%c0_37, %c0_38] : memref<2x128xf32, #tpu.memory_space<vmem>>, vector<2x128xf32>
    %c0_39 = arith.constant 0 : index
    %c0_40 = arith.constant 0 : index
    %72 = vector.load %arg9[%c0_39, %c0_40] : memref<128x128xf32, #tpu.memory_space<vmem>>, vector<128x128xf32>
    %cst_41 = arith.constant dense<0.000000e+00> : vector<2x128xf32>
    %73 = tpu.matmul %71, %72, %cst_41 {dimension_numbers = #tpu.dot_dimension_numbers<[1], [0], [0], [1], [0, 0, 1, 1], [], []>} : vector<2x128xf32>, vector<128x128xf32>, vector<2x128xf32> -> vector<2x128xf32>
    %c0_42 = arith.constant 0 : index
    %c0_43 = arith.constant 0 : index
    %74 = vector.load %arg10[%c0_42, %c0_43] : memref<1x128xf32, #tpu.memory_space<vmem>>, vector<1x128xf32>
    %75 = vector.broadcast %74 : vector<1x128xf32> to vector<2x128xf32>
    %76 = arith.addf %73, %75 : vector<2x128xf32>
    %77 = vector.extract_strided_slice %76 {offsets = [0, 0], sizes = [2, 32], strides = [1, 1]} : vector<2x128xf32> to vector<2x32xf32>
    %78 = arith.negf %77 : vector<2x32xf32>
    %79 = math.exp %78 : vector<2x32xf32>
    %cst_44 = arith.constant 1.000000e+00 : f32
    %80 = vector.broadcast %cst_44 : f32 to vector<2x32xf32>
    %81 = arith.addf %80, %79 : vector<2x32xf32>
    %82 = arith.divf %80, %81 : vector<2x32xf32>
    %83 = vector.extract_strided_slice %76 {offsets = [0, 32], sizes = [2, 32], strides = [1, 1]} : vector<2x128xf32> to vector<2x32xf32>
    %84 = arith.negf %83 : vector<2x32xf32>
    %85 = math.exp %84 : vector<2x32xf32>
    %cst_45 = arith.constant 1.000000e+00 : f32
    %86 = vector.broadcast %cst_45 : f32 to vector<2x32xf32>
    %87 = arith.addf %86, %85 : vector<2x32xf32>
    %88 = arith.divf %86, %87 : vector<2x32xf32>
    %89 = vector.extract_strided_slice %76 {offsets = [0, 64], sizes = [2, 32], strides = [1, 1]} : vector<2x128xf32> to vector<2x32xf32>
    %90 = math.tanh %89 : vector<2x32xf32>
    %91 = vector.extract_strided_slice %76 {offsets = [0, 96], sizes = [2, 32], strides = [1, 1]} : vector<2x128xf32> to vector<2x32xf32>
    %92 = arith.negf %91 : vector<2x32xf32>
    %93 = math.exp %92 : vector<2x32xf32>
    %cst_46 = arith.constant 1.000000e+00 : f32
    %94 = vector.broadcast %cst_46 : f32 to vector<2x32xf32>
    %95 = arith.addf %94, %93 : vector<2x32xf32>
    %96 = arith.divf %94, %95 : vector<2x32xf32>
    %97 = arith.mulf %88, %6 : vector<2x32xf32>
    %98 = arith.mulf %82, %90 : vector<2x32xf32>
    %99 = arith.addf %97, %98 : vector<2x32xf32>
    %100 = math.tanh %99 : vector<2x32xf32>
    %101 = arith.mulf %96, %100 : vector<2x32xf32>
    %c0_47 = arith.constant 0 : index
    %c0_48 = arith.constant 0 : index
    %102 = vector.load %arg14[%c0_47, %c0_48] : memref<2x32xf32, #tpu.memory_space<vmem>>, vector<2x32xf32>
    tpu.vector_store %arg14[%c0_47, %c0_48], %99 {strides = array<i32>} : memref<2x32xf32, #tpu.memory_space<vmem>>, vector<2x32xf32>,
    %c0_49 = arith.constant 0 : index
    %c0_50 = arith.constant 0 : index
    %103 = vector.load %arg12[%c0_49, %c0_50] : memref<2x64xf32, #tpu.memory_space<vmem>>, vector<2x32xf32>
    tpu.vector_store %arg12[%c0_49, %c0_50], %101 {strides = array<i32>} : memref<2x64xf32, #tpu.memory_space<vmem>>, vector<2x32xf32>,
    %c0_51 = arith.constant 0 : index
    %c32 = arith.constant 32 : index
    %104 = vector.load %arg12[%c0_51, %c32] : memref<2x64xf32, #tpu.memory_space<vmem>>, vector<2x32xf32>
    tpu.vector_store %arg12[%c0_51, %c32], %36 {strides = array<i32>} : memref<2x64xf32, #tpu.memory_space<vmem>>, vector<2x32xf32>,
    %c0_52 = arith.constant 0 : index
    %c0_53 = arith.constant 0 : index
    %c0_54 = arith.constant 0 : index
    %105 = vector.load %arg11[%c0_52, %c0_53, %c0_54] : memref<1x2x32xf32, #tpu.memory_space<vmem>>, vector<1x2x32xf32>
    %106 = vector.shape_cast %105 : vector<1x2x32xf32> to vector<2x32xf32>
    %107 = vector.shape_cast %101 : vector<2x32xf32> to vector<1x2x32xf32>
    tpu.vector_store %arg11[%c0_52, %c0_53, %c0_54], %107 {strides = array<i32>} : memref<1x2x32xf32, #tpu.memory_space<vmem>>, vector<1x2x32xf32>,
    return
  }
  func.func @transform_0(%arg0: i32, %arg1: i32) -> (i32, i32, i32) {
    %c0_i32 = arith.constant 0 : i32
    %c0_i32_0 = arith.constant 0 : i32
    return %arg1, %arg0, %c0_i32 : i32, i32, i32
  }
  func.func @transform_1(%arg0: i32, %arg1: i32) -> (i32, i32, i32) {
    %c0_i32 = arith.constant 0 : i32
    %c0_i32_0 = arith.constant 0 : i32
    %c0_i32_1 = arith.constant 0 : i32
    return %arg0, %c0_i32, %c0_i32_0 : i32, i32, i32
  }
  func.func @transform_2(%arg0: i32, %arg1: i32) -> (i32, i32, i32) {
    %c0_i32 = arith.constant 0 : i32
    %c0_i32_0 = arith.constant 0 : i32
    %c0_i32_1 = arith.constant 0 : i32
    return %arg0, %c0_i32, %c0_i32_0 : i32, i32, i32
  }
  func.func @transform_3(%arg0: i32, %arg1: i32) -> (i32, i32) {
    %c0_i32 = arith.constant 0 : i32
    %c0_i32_0 = arith.constant 0 : i32
    %c0_i32_1 = arith.constant 0 : i32
    return %c0_i32, %c0_i32_0 : i32, i32
  }
  func.func @transform_4(%arg0: i32, %arg1: i32) -> (i32, i32) {
    %c0_i32 = arith.constant 0 : i32
    %c0_i32_0 = arith.constant 0 : i32
    %c0_i32_1 = arith.constant 0 : i32
    return %c0_i32, %c0_i32_0 : i32, i32
  }
  func.func @transform_5(%arg0: i32, %arg1: i32) -> (i32, i32) {
    %c0_i32 = arith.constant 0 : i32
    %c0_i32_0 = arith.constant 0 : i32
    %c0_i32_1 = arith.constant 0 : i32
    return %c0_i32, %c0_i32_0 : i32, i32
  }
  func.func @transform_6(%arg0: i32, %arg1: i32) -> (i32, i32) {
    %c0_i32 = arith.constant 0 : i32
    %c0_i32_0 = arith.constant 0 : i32
    %c0_i32_1 = arith.constant 0 : i32
    return %c0_i32, %c0_i32_0 : i32, i32
  }
  func.func @transform_7(%arg0: i32, %arg1: i32) -> (i32, i32) {
    %c0_i32 = arith.constant 0 : i32
    %c0_i32_0 = arith.constant 0 : i32
    %c0_i32_1 = arith.constant 0 : i32
    return %c0_i32, %c0_i32_0 : i32, i32
  }
  func.func @transform_8(%arg0: i32, %arg1: i32) -> (i32, i32) {
    %c0_i32 = arith.constant 0 : i32
    %c0_i32_0 = arith.constant 0 : i32
    %c0_i32_1 = arith.constant 0 : i32
    return %c0_i32, %c0_i32_0 : i32, i32
  }
  func.func @transform_9(%arg0: i32, %arg1: i32) -> (i32, i32, i32) {
    %c0_i32 = arith.constant 0 : i32
    %c0_i32_0 = arith.constant 0 : i32
    return %arg1, %arg0, %c0_i32 : i32, i32, i32
  }
}

</mosaic_0001>

<bundles_post_ra>
// kernel: tpu_custom_call.1
= control target key start
LH: loop header
LB: loop body
LE: loop exit
PB: predicated region body
PF: predicated region fallthrough
CT: control target
= control target key end

     0   :  { %s1804_s0 = inlined_call_operand.hbm [shape: f32[8,2,128], index: 0, kind: input, shape index: {}]   ;;  %s1805_s1 = inlined_call_operand.hbm [shape: f32[2,16,32], index: 1, kind: input, shape index: {}]   ;;  %s1806_s2 = inlined_call_operand.hbm [shape: f32[2,16,64], index: 2, kind: input, shape index: {}]   ;;  %s1807_s3 = inlined_call_operand.hbm [shape: f32[64,128], index: 3, kind: input, shape index: {}]   ;;  %s1808_s4 = inlined_call_operand.hbm [shape: f32[32,32], index: 4, kind: input, shape index: {}]   ;;  %s1809_s5 = inlined_call_operand.vmem [shape: f32[1,32], index: 5, kind: input, shape index: {}]   ;;  %s1810_s6 = inlined_call_operand.vmem [shape: f32[1,32], index: 6, kind: input, shape index: {}]   ;;  %s1811_s7 = inlined_call_operand.hbm [shape: f32[128,128], index: 7, kind: input, shape index: {}]   ;;  %s1812_s8 = inlined_call_operand.vmem [shape: f32[1,128], index: 8, kind: input, shape index: {}]   ;;  %s1813_s9 = inlined_call_operand.hbm [shape: f32[8,2,32], index: 9, kind: output, shape index: {}]  }
   0x1   :  { %1815 = sst [smem:[#allocation23_spill]] %s1805_s1 }
   0x2   :  { %1816 = sst [smem:[#allocation24_spill]] %s1806_s2 }
   0x3   :  { %1817 = sst [smem:[#allocation25_spill]] %s1807_s3 }
   0x4   :  { %1818 = sst [smem:[#allocation26_spill]] %s1808_s4 }
   0x5   :  { %14 = vsyncpa [#allocation7], 0 }
   0x6   :  { %16 = vsyncpa [#allocation7 + $0x1], 0 }
   0x7   :  { %17 = vsyncpa [#allocation10], 0 }
   0x8   :  { %18 = vsyncpa [#allocation13], 0 }
   0x9   :  { %19 = vsyncpa [#allocation16], 0 }
   0xa   :  { %20 = vsyncpa [#allocation8], 0 }
   0xb   :  { %22 = vsyncpa [#allocation8 + $0x1], 0  ;;  %s1557_s30 = smov 0   ;;  %s1559_s10 = smov 0  }
   0xc   :  { %s1561_s11 = smov 0   ;;  %s1563_s12 = smov 0  }
   0xd   :  { %s1565_s13 = smov 0   ;;  %s1567_s14 = smov 0  }
   0xe LB: > { %s1814_s15 = sadd.s32 4294967295, %s1493_s14   ;;  %p1033_p0 = scmp.ge.s32.totalorder %s1493_s14, 1  ;;  %s1493_s14 = sphi %s1567_s14, %s28_s14   ;;  %s1489_s13 = sphi %s1565_s13, %s1835_s13   ;;  %s1485_s12 = sphi %s1563_s12, %s1834_s12   ;;  %s1481_s11 = sphi %s1561_s11, %s1833_s11   ;;  %s1477_s10 = sphi %s1559_s10, %s1832_s10   ;;  %s1473_s30 = sphi %s1557_s30, %s1831_s30  }
   0xf   : > { %p1591_p1 = scmp.eq.s32.totalorder %s1814_s15, 0  ;;  %p279_p2 = scmp.lt.s32.totalorder %s1493_s14, 9 }
  0x10   : > { %s1820_s1 = sld [smem:[#allocation23_spill]]  ;;  %s1495_s21 = smov [#allocation9]  }
  0x11   : > { %p1599_p3 = pnand %p1033_p0, %p279_p2  ;;  %s296_s22 = sshll.u32 %s1495_s21, 4  ;;  %s297_s22 = int_to_ptr.vmem [resolvable:$true] %s296_s22 }
  0x12   : > { %s1823_s3 = sld [smem:[#allocation25_spill]]  ;;  %s1496_s27 = smov 128  }
  0x13   : > { %p1083_p4 = pneg %p1599_p3  ;;  %s1497_s28 = smov 8  }
  0x14   : > { %s1498_s29 = smov [#allocation12]   ;;  %s1824_s2 = sld [smem:[#allocation24_spill]] }
  0x15   : > { %p1607_p5 = pnand %p1083_p4, %p1591_p1  ;;  %s328_s17 = sshll.u32 %s1498_s29, 4  ;;  %s329_s17 = int_to_ptr.vmem [resolvable:$true] %s328_s17 }
  0x16   : > { %s294_s19 = sshll.u32 %s1820_s1, 4  ;;  %s1825_s4 = sld [smem:[#allocation26_spill]]  ;;  %s295_s19 = int_to_ptr.hbm [resolvable:$true] %s294_s19 }
  0x17   : > { %1086 = dma.hbm_to_vmem [thread:$0]  (!%p1607_p5), %s295_s19, 512, %s297_s22, [#allocation10], %s1496_s27, %s1496_s27, %s1497_s28  }
  0x18   : > { %s326_s26 = sshll.u32 %s1823_s3, 4  ;;  %s1499_s3 = smov [#allocation11]   ;;  %s327_s26 = int_to_ptr.hbm [resolvable:$true] %s326_s26 }
  0x19   : > { %1092 = dma.hbm_to_vmem [thread:$0]  (!%p1607_p5), %s327_s26, 1024, %s329_s17, [#allocation13], %s1496_s27, %s1496_s27, %s1497_s28  }
  0x1a   : > { %s312_s15 = sshll.u32 %s1824_s2, 4  ;;  %s314_s19 = sshll.u32 %s1499_s3, 4  ;;  %s313_s15 = int_to_ptr.hbm [resolvable:$true] %s312_s15  ;;  %s315_s19 = int_to_ptr.vmem [resolvable:$true] %s314_s19 }
  0x1b   : > { %1089 = dma.hbm_to_vmem [thread:$0]  (!%p1607_p5), %s313_s15, 512, %s315_s19, [#allocation10], %s1496_s27, %s1496_s27, %s1497_s28  }
  0x1c   : > { %s340_s1 = sshll.u32 %s1825_s4, 4  ;;  %s1500_s22 = smov [#allocation14]   ;;  %s341_s1 = int_to_ptr.hbm [resolvable:$true] %s340_s1 }
  0x1d   : > { %s342_s26 = sshll.u32 %s1500_s22, 4  ;;  %s360_s18 = sshll.u32 %s1811_s7, 4  ;;  %s343_s26 = int_to_ptr.vmem [resolvable:$true] %s342_s26  ;;  %s361_s18 = int_to_ptr.hbm [resolvable:$true] %s360_s18 }
  0x1e   : > { %1095 = dma.hbm_to_vmem [thread:$0]  (!%p1607_p5), %s341_s1, 512, %s343_s26, [#allocation13], %s1496_s27, %s1496_s27, %s1497_s28  }
  0x1f   : > { %s1501_s3 = smov [#allocation15]   ;;  %s1032_s15 = sadd.s32 4294967294, %s1493_s14  }
  0x20   : > { %s362_s21 = sshll.u32 %s1501_s3, 4  ;;  %s37_s24 = sadd.s32 1, %s1489_s13  ;;  %s363_s21 = int_to_ptr.vmem [resolvable:$true] %s362_s21 }
  0x21   : > { %1098 = dma.hbm_to_vmem [thread:$0]  (!%p1607_p5), %s361_s18, 2048, %s363_s21, [#allocation16], %s1496_s27, %s1496_s27, %s1497_s28  }
  0x22   : > { %s49_s25 = sadd.s32 1, %s1481_s11  ;;  %p38_p6 = scmp.ge.s32.totalorder %s37_s24, 8 }
  0x23   : > { %p56_p7 = scmp.ne.s32.totalorder %s1481_s11, %s1477_s10  ;;  %p57_p8 = scmp.eq.s32.totalorder %s1493_s14, 0 }
  0x24   : > { %p62_p9 = scmp.ne.s32.totalorder %s1477_s10, %s1473_s30  ;;  %s1837_s24 = smov (%p38_p6, %s37_s24), 0 }
  0x25   : > { %p1643_p10 = por %p57_p8, %p56_p7  ;;  %s44_s27 = ssub.s32 %s1489_s13, %s1837_s24 }
  0x26   : > { %p1649_p11 = por %p1591_p1, %p62_p9  ;;  %s1828_s28 = sadd.s32 4294967295, %s1493_s14  }
  0x27   : > { %p266_p12 = scmp.eq.s32.totalorder %s1828_s28, 7  ;;  %p47_p13 = scmp.eq.s32.totalorder %s44_s27, 0 }
  0x28   : > { %p272_p0 = scmp.eq.s32.totalorder %s1032_s15, 7  ;;  %p1112_p4 = scmp.lt.s32.totalorder %s1493_s14, 8 }
  0x29   : > { %p1657_p2 = por %p266_p12, %p56_p7  ;;  %s379_s29 = sand.u32 1, %s1481_s11  }
  0x2a   : > { %s1663_s22 = scalar_select %p47_p13, %s1481_s11, %s49_s25  }
  0x2b   : > { %p1665_p5 = por %p272_p0, %p62_p9  ;;  %s1040_s17 = sshll.u32 %s379_s29, 1 }
  0x2c   : > { %s1041_s18 = sshll.u32 %s1489_s13, 1  ;;  %s383_s27 = scalar_lea.vmem [#allocation6], %s1040_s17 }
  0x2d   : > { %s388_s28 = scalar_lea.hbm %s1804_s0, %s1041_s18  ;;  %s392_s15 = sshll.u32 %s383_s27, 4  ;;  %s393_s15 = int_to_ptr.vmem [resolvable:$true] %s392_s15 }
  0x2e   : > { %s390_s2 = sshll.u32 %s388_s28, 4  ;;  %p1100_p6 = pnand %p1112_p4, %p1643_p10  ;;  %s391_s2 = int_to_ptr.hbm [resolvable:$true] %s390_s2 }
  0x2f   : > { %s380_s25 = scalar_lea.sflag [#allocation7], %s379_s29  ;;  %401 = sbr.rel (%p1599_p3) target bundleno = 2082 (0x822), region = 56 }
  0x30   : > { %1102 = dma.hbm_to_vmem [thread:$0]  (!%p1100_p6), %s391_s2, 32, %s393_s15, %s380_s25  }
  0x31   : > { %s1679_s4 = sand.u32 (!%p1599_p3), 1, %s1477_s10  }
  0x32   : > { %s1043_s3 = sshll.u32 (!%p1599_p3), %s1679_s4, 1  ;;  %s404_s18 = scalar_lea.sflag (!%p1599_p3), [#allocation7], %s1679_s4 }
  0x33   : > { %s1683_s17 = scalar_lea.vmem (!%p1599_p3), [#allocation6], %s1043_s3 }
  0x34   : > { %1452 = dma.done.wait (%p1649_p11), %s404_s18, 32  }
  0x35   : > { %1454 = vsyncadd (%p1649_p11), %s404_s18, 4294967264 }
  0x36   : > { %1456 = dma.done.wait (%p1591_p1), [#allocation10], 1024  }
  0x37   : > { %1458 = vsyncadd (%p1591_p1), [#allocation10], 4294966272 }
  0x38   : > { %1460 = dma.done.wait (%p1591_p1), [#allocation13], 1536  }
  0x39   : > { %1462 = vsyncadd (%p1591_p1), [#allocation13], 4294965760 }
  0x3a   : > { %1464 = dma.done.wait (%p1591_p1), [#allocation16], 2048  }
  0x3b   : > { %1466 = vsyncadd (%p1591_p1), [#allocation16], 4294965248  ;;  %s1701_s2 = scalar_lea.vmem [#allocation17], %s1043_s3  ;;  %p1050_p3 = scmp.ne.s32.totalorder %s1485_s12, 0 }
  0x3d   : > { %473 = sbr.rel (%p1050_p3) target bundleno = 70 (0x46), region = 84 }
  0x42   : > { %vm474_vm0 = vcmask 517120   ;;  %vm476_vm1 = vcmask 254976   ;;  %v1502_v0 = vmov 0.0  }
  0x43   : > { %475 = vst.msk [vmem:[#allocation2] sm:$0x3] %vm474_vm0, %v1502_v0 }
  0x44   : > { %477 = vst.msk [vmem:[#allocation3] sm:$0x3] %vm476_vm1, %v1502_v0 }
  0x45   : > { %478 = vst.msk [vmem:[#allocation4] sm:$0x3] %vm476_vm1, %v1502_v0 }
  0x46 PF: > { %v489_v1 = vld [vmem:[#allocation12 + $0x38] sm:$0xff]  ;;  %v488_v2 = vld [vmem:[#allocation12 + $0x30] sm:$0xff]  ;;  %v487_v3 = vld [vmem:[#allocation12 + $0x28] sm:$0xff]  ;;  %vm491_vm2 = vcmask 523264   ;;  %s1503_s16 = smov 64   ;;  %s1504_s20 = smov 32  }
  0x47   : > { %503 = vmatpush.msra.mxu0 %v489_v1  ;;  %v486_v4 = vld [vmem:[#allocation12 + $0x20] sm:$0xff]  ;;  %v485_v5 = vld [vmem:[#allocation12 + $0x18] sm:$0xff]  ;;  %v484_v6 = vld [vmem:[#allocation12 + $0x10] sm:$0xff]  ;;  %vm573_vm7 = vcmask 261120   ;;  %vm643_vm8 = vcmask 130112   ;;  %vm648_vm9 = vcmask 1041409  }
  0x48   : > { %v483_v7 = vld [vmem:[#allocation12 + $0x8] sm:$0xff]  ;;  %v482_v8 = vld [vmem:[#allocation12] sm:$0xff]  ;;  %v490_v10 = vld [vmem:[%s1683_s17] sm:$0x3]  ;;  %vm651_vm10 = vcmask 123904   ;;  %s1506_s28 = smov 96  }
  0x49   : > { %504 = vmatpush.msra.mxu0 %v488_v2  ;;  %v565_v35 = vld [vmem:[#allocation14 + $0x18] sm:$0xff]  ;;  %v564_v36 = vld [vmem:[#allocation14 + $0x10] sm:$0xff]  ;;  %v563_v37 = vld [vmem:[#allocation14 + $0x8] sm:$0xff]  ;;  %vm772_vm15 = vcmask 517120   ;;  %vm777_vm0 = vcmask 779776   ;;  %vm782_vm1 = vcmask 1042176  }
  0x4a   : > { %v1704_v9 = vld [vmem:[#allocation2] sm:$0x3]  ;;  %588 = vmatpush.msra.mxu1 %v565_v35  ;;  %v562_v38 = vld [vmem:[#allocation14] sm:$0xff]  ;;  %v597_v46 = vld [vmem:[#allocation9 + $0x8] sm:$0xff]  ;;  %s1056_s25 = sshll.u32 %s1485_s12, 1  ;;  %s896_s1 = sshll.u32 %s1701_s2, 4  ;;  %s897_s1 = int_to_ptr.vmem [resolvable:$true] %s896_s1 }
  0x4b   : > { %505 = vmatpush.msra.mxu0 %v487_v3  ;;  %v480_v14 = vld [vmem:[#allocation3] sm:$0x3]  ;;  %v1182_v42 = vld [vmem:[%s1809_s5] ss:$0 sm:$0xff]  ;;  %v596_v45 = vld [vmem:[#allocation9] sm:$0xff]  ;;  %s894_s17 = scalar_lea.hbm %s1813_s9, %s1056_s25 }
  0x4c   : > { %589 = vmatpush.msra.mxu1 %v564_v36  ;;  %v598_v49 = vld [vmem:[#allocation9 + $0x10] sm:$0xff]  ;;  %v599_v50 = vld [vmem:[#allocation9 + $0x18] sm:$0xff]  ;;  %s898_s23 = sshll.u32 %s894_s17, 4  ;;  %s899_s23 = int_to_ptr.hbm [resolvable:$true] %s898_s23 }
  0x4d   : > { %506 = vmatpush.msra.mxu0 %v486_v4  ;;  %v1183_v56 = vld [vmem:[%s1810_s6] ss:$0 sm:$0xff] }
  0x4e   : > { %590 = vmatpush.msra.mxu1 %v563_v37 }
  0x4f   : > { %507 = vmatpush.msra.mxu0 %v485_v5  ;;  %v638_v5 = vlaneseq }
  0x50   : > { %591 = vmatpush.msra.mxu1 %v562_v38 }
  0x51   : > { %508 = vmatpush.msra.mxu0 %v484_v6  ;;  %v639_v6 = vand.u32 127, %v638_v5  ;;  %v799_v5 = vld [vmem:[#allocation15 + $0x70] sm:$0xff] }
  0x53   : > { %509 = vmatpush.msra.mxu0 %v483_v7 }
  0x55   : > { %510 = vmatpush.msra.mxu0 %v482_v8  ;;  %v641_v8 = vadd.s32 4294967288, %v639_v6 }
  0x56   : > { %1051 = vmatmul.msk.f32.vlgmr.msra.gmra.mxu0 %vm491_vm2, %v1704_v9 }
  0xd3   : > { %v512_v11 = vpop.f32.mrf.mxu0 }
  0xd4   : > { %v513_v12 = vadd.f32 %v512_v11, %v490_v10 }
  0xd6   : > { %1185 = vtanh.f32 %v513_v12  ;;  %v1052_v15 = vmul.f32 -1.442695, %v513_v12 }
  0xd8   : > { %1187 = vpow2.f32 %v1052_v15 }
  0xdc   : > { %v1186_v13 = vpop.eup %1185 }
  0xdd   : > { %541 = vrot.lane.b32.xlu0 %v1186_v13, %s1503_s16 }
  0xde   : > { %v1188_v16 = vpop.eup %1187 }
  0xdf   : > { %v518_v17 = vadd.f32 1.0, %v1188_v16 }
  0xe1   : > { %1189 = vrcp.f32 %v518_v17  ;;  %v530_v23 = vand.u32 2147483648, %v518_v17  ;;  %vm524_vm4 = vweird.f32 %v518_v17  ;;  %v528_v24 = vand.u32 2147483647, %v518_v17 }
  0xe3   : > { %v531_v26 = vor.u32 1.1754944e-38, %v530_v23  ;;  %vm529_vm6 = vcmp.eq.f32.partialorder %v528_v24, 8.507059e+37 }
  0xe5   : > { %536 = vrot.lane.b32.xlu0 %v480_v14, %s1504_s20 }
  0xe7   : > { %v1190_v18 = vpop.eup %1189 }
  0xe8   : > { %v520_v19 = vmul.f32 %v1190_v18, %v518_v17  ;;  %vm525_vm3 = vweird.f32 %v1190_v18 }
  0xe9   : > { %vm526_vm5 = vmor %vm524_vm4, %vm525_vm3 }
  0xea   : > { %v521_v20 = vsub.f32 1.0, %v520_v19 }
  0xec   : > { %v522_v21 = vmul.f32 %v1190_v18, %v521_v20 }
  0xee   : > { %v523_v22 = vadd.f32 %v1190_v18, %v522_v21  ;;  %v1505_v21 = vmov 0  }
  0xef   : > { %1181 = vset.pattern.permute.xlu2 %v1505_v21  ;;  %1180 = vset.pattern.permute.xlu1 %v1505_v21 }
  0xf0   : > { %v527_v25 = vsel %vm526_vm5, %v1190_v18, %v523_v22  ;;  %1179 = vset.pattern.permute.xlu0 %v1505_v21 }
  0xf1   : > { %v532_v28 = vsel %vm529_vm6, %v531_v26, %v527_v25  ;;  %vm560_vm6 = vcmask 254976  }
 0x14f   : > { %v542_v27 = vpop.permute.xlu0 %541 }
 0x150   : > { %v544_v29 = vmul.f32 %v542_v27, %v532_v28 }
 0x152   : > { %546 = vrot.lane.b32.xlu1 %v544_v29, %s1504_s20 }
 0x157   : > { %v537_v30 = vpop.permute.xlu0 %536 }
 0x158   : > { %v539_v31 = vmul.f32 %v537_v30, %v532_v28 }
 0x1c4   : > { %v547_v32 = vpop.permute.xlu1 %546 }
 0x1c5   : > { %v1712_v33 = vadd.f32 %v547_v32, %v539_v31 }
 0x1c7   : > { %1191 = vtanh.f32 %v1712_v33 }
 0x1cd   : > { %v1192_v34 = vpop.eup %1191 }
 0x1ce   : > { %552 = vrot.lane.b32.xlu1 %v1192_v34, %s1503_s16 }
 0x240   : > { %v553_v39 = vpop.permute.xlu1 %552 }
 0x241   : > { %v1716_v40 = vmul.f32 %v553_v39, %v532_v28 }
 0x243   : > { %571 = vrot.lane.b32.xlu2 %v1716_v40, %s1504_s20 }
 0x29d   : > { %v572_v41 = vpop.permute.xlu2 %571 }
 0x29e   : > { %1053 = vmatmul.msk.f32.vlgmr.msra.gmra.mxu1 %vm573_vm7, %v572_v41 }
 0x31b   : > { %v593_v43 = vpop.f32.mrf.mxu1 }
 0x31c   : > { %v594_v44 = vadd.f32 %v1182_v42, %v593_v43 }
 0x31e   : > { %v601_v47 = vrot.slane %v594_v44, 1  ;;  %v602_v48 = vperm.slane %v594_v44, 0 }
 0x320   : > { %v603_v51 = vperm.slane %v601_v47, 0  ;;  %v606_v52 = vadd.f32 %v602_v48, %v596_v45  ;;  %v607_v53 = vadd.f32 %v602_v48, %v597_v46 }
 0x322   : > { %v608_v54 = vadd.f32 %v603_v51, %v598_v49  ;;  %v609_v55 = vadd.f32 %v603_v51, %v599_v50  ;;  %1193 = vtanh.f32 %v606_v52 }
 0x323   : > { %1195 = vtanh.f32 %v607_v53 }
 0x324   : > { %1197 = vtanh.f32 %v608_v54 }
 0x325   : > { %1199 = vtanh.f32 %v609_v55 }
 0x328   : > { %v1194_v57 = vpop.eup %1193 }
 0x329   : > { %v1196_v58 = vpop.eup %1195  ;;  %v618_v59 = vmul.f32 %v1194_v57, %v1183_v56 }
 0x32a   : > { %v1198_v60 = vpop.eup %1197  ;;  %v619_v61 = vmul.f32 %v1196_v58, %v1183_v56 }
 0x32b   : > { %v622_v62 = vsel %vm573_vm7, %v618_v59, 0.0  ;;  %v620_v63 = vmul.f32 %v1198_v60, %v1183_v56  ;;  %v1200_v0 = vpop.eup %1199 }
 0x32c   : > { %v625_v1 = vsel %vm573_vm7, %v619_v61, 0.0  ;;  %623 = vadd.xlane.f32.xlu2 %v622_v62  ;;  %v621_v3 = vmul.f32 %v1200_v0, %v1183_v56 }
 0x32d   : > { %626 = vadd.xlane.f32.xlu0 %v625_v1  ;;  %v628_v2 = vsel %vm573_vm7, %v620_v63, 0.0 }
 0x32e   : > { %629 = vadd.xlane.f32.xlu1 %v628_v2  ;;  %v631_v4 = vsel %vm573_vm7, %v621_v3, 0.0  ;;  %vm879_vm7 = vcmask 517376  }
 0x334   : > { %632 = vadd.xlane.f32.xlu2 %v631_v4  ;;  %v800_v4 = vld [vmem:[#allocation15 + $0x78] sm:$0xff] }
 0x335   : > { %805 = vmatpush.msra.mxu2 %v800_v4 }
 0x337   : > { %806 = vmatpush.msra.mxu2 %v799_v5 }
 0x39f   : > { %v624_v7 = vpop.xlane.xlu2 %623 }
 0x3a0   : > { %v627_v10 = vpop.xlane.xlu0 %626  ;;  %v640_v13 = vperm.slane %v624_v7, %v639_v6 }
 0x3a1   : > { %v630_v11 = vpop.xlane.xlu1 %629  ;;  %v642_v12 = vperm.slane %v627_v10, %v641_v8 }
 0x3a2   : > { %v645_v15 = vperm.slane %v630_v11, %v639_v6 }
 0x3a3   : > { %v644_v17 = vsel %vm643_vm8, %v642_v12, %v640_v13  ;;  %v793_v12 = vld [vmem:[#allocation15 + $0x40] sm:$0xff]  ;;  %v792_v13 = vld [vmem:[#allocation15 + $0x38] sm:$0xff] }
 0x3a7   : > { %v633_v14 = vpop.xlane.xlu2 %632 }
 0x3a8   : > { %v646_v16 = vperm.slane %v633_v14, %v641_v8 }
 0x3aa   : > { %v647_v18 = vsel %vm643_vm8, %v646_v16, %v645_v15  ;;  %v789_v15 = vld [vmem:[#allocation15 + $0x20] sm:$0xff]  ;;  %v788_v16 = vld [vmem:[#allocation15 + $0x18] sm:$0xff] }
 0x3ab   : > { %v649_v19 = vsel %vm648_vm9, %v647_v18, %v644_v17  ;;  %v723_v17 = vld [vmem:[#allocation11 + $0x8] sm:$0xff]  ;;  %v722_v18 = vld [vmem:[#allocation11] sm:$0xff] }
 0x3ac   : > { %v652_v20 = vsel %vm651_vm10, %v649_v19, -inf  ;;  %v787_v19 = vld [vmem:[#allocation15 + $0x10] sm:$0xff] }
 0x3ad   : > { %653 = vmax.xlane.f32.xlu2 %v652_v20 }
 0x420   : > { %v654_v22 = vpop.xlane.xlu2 %653 }
 0x421   : > { %v656_v23 = vperm.slane %v654_v22, 0  ;;  %v657_v24 = vperm.slane %v654_v22, 1 }
 0x423   : > { %v660_v25 = vsub.f32 %v624_v7, %v656_v23  ;;  %v661_v26 = vsub.f32 %v627_v10, %v656_v23  ;;  %v662_v27 = vsub.f32 %v630_v11, %v657_v24  ;;  %v663_v31 = vsub.f32 %v633_v14, %v657_v24  ;;  %v797_v7 = vld [vmem:[#allocation15 + $0x60] sm:$0xff]  ;;  %v795_v10 = vld [vmem:[#allocation15 + $0x50] sm:$0xff]  ;;  %v794_v11 = vld [vmem:[#allocation15 + $0x48] sm:$0xff] }
 0x424   : > { %v791_v14 = vld [vmem:[#allocation15 + $0x30] sm:$0xff]  ;;  %v786_v24 = vld [vmem:[#allocation15 + $0x8] sm:$0xff] }
 0x425   : > { %v664_v28 = vmul.f32 1.442695, %v660_v25  ;;  %v666_v29 = vmul.f32 1.442695, %v661_v26  ;;  %v668_v30 = vmul.f32 1.442695, %v662_v27 }
 0x426   : > { %v670_v32 = vmul.f32 1.442695, %v663_v31  ;;  %v785_v27 = vld [vmem:[#allocation15] sm:$0xff]  ;;  %v725_v31 = vld [vmem:[#allocation11 + $0x18] sm:$0xff] }
 0x427   : > { %1201 = vpow2.f32 %v664_v28 }
 0x428   : > { %1203 = vpow2.f32 %v666_v29  ;;  %v481_v29 = vld [vmem:[#allocation4] sm:$0x3] }
 0x429   : > { %1205 = vpow2.f32 %v668_v30 }
 0x42a   : > { %1207 = vpow2.f32 %v670_v32  ;;  %v724_v32 = vld [vmem:[#allocation11 + $0x10] sm:$0xff] }
 0x42d   : > { %v1202_v34 = vpop.eup %1201 }
 0x42e   : > { %v1204_v35 = vpop.eup %1203  ;;  %677 = vperm.xlu0 %1179, %v1202_v34  }
 0x42f   : > { %v1206_v36 = vpop.eup %1205  ;;  %680 = vperm.xlu1 %1180, %v1204_v35  }
 0x430   : > { %683 = vperm.xlu2 %1181, %v1206_v36   ;;  %v1208_v37 = vpop.eup %1207 }
 0x437   : > { %686 = vperm.xlu1 %1180, %v1208_v37  }
 0x48a   : > { %v684_v41 = vpop.permute.xlu2 %683 }
 0x48b   : > { %v691_v45 = vperm.slane %v684_v41, %v639_v6 }
 0x4a0   : > { %v678_v39 = vpop.permute.xlu0 %677 }
 0x4a1   : > { %v681_v38 = vpop.permute.xlu1 %680  ;;  %v688_v43 = vperm.slane %v678_v39, %v639_v6  ;;  %v798_v6 = vld [vmem:[#allocation15 + $0x68] sm:$0xff] }
 0x4a2   : > { %v689_v42 = vperm.slane %v681_v38, %v641_v8  ;;  %807 = vmatpush.msra.mxu2 %v798_v6 }
 0x4a4   : > { %v690_v47 = vsel %vm643_vm8, %v689_v42, %v688_v43  ;;  %808 = vmatpush.msra.mxu2 %v797_v7 }
 0x4a9   : > { %v687_v44 = vpop.permute.xlu1 %686 }
 0x4aa   : > { %v692_v46 = vperm.slane %v687_v44, %v641_v8  ;;  %v796_v8 = vld [vmem:[#allocation15 + $0x58] sm:$0xff] }
 0x4ab   : > { %809 = vmatpush.msra.mxu2 %v796_v8 }
 0x4ac   : > { %v693_v48 = vsel %vm643_vm8, %v692_v46, %v691_v45 }
 0x4ad   : > { %v694_v49 = vsel %vm648_vm9, %v693_v48, %v690_v47  ;;  %810 = vmatpush.msra.mxu2 %v795_v10 }
 0x4ae   : > { %v696_v50 = vsel %vm651_vm10, %v694_v49, 0.0 }
 0x4af   : > { %697 = vadd.xlane.f32.xlu2 %v696_v50  ;;  %811 = vmatpush.msra.mxu2 %v794_v11 }
 0x4b1   : > { %812 = vmatpush.msra.mxu2 %v793_v12 }
 0x4b3   : > { %813 = vmatpush.msra.mxu2 %v792_v13 }
 0x4b5   : > { %814 = vmatpush.msra.mxu2 %v791_v14 }
 0x522   : > { %v698_v51 = vpop.xlane.xlu2 %697 }
 0x523   : > { %1209 = vrcp.f32 %v698_v51  ;;  %v710_v55 = vand.u32 2147483648, %v698_v51  ;;  %v708_v57 = vand.u32 2147483647, %v698_v51  ;;  %vm704_vm12 = vweird.f32 %v698_v51 }
 0x525   : > { %v711_v59 = vor.u32 1.1754944e-38, %v710_v55  ;;  %vm709_vm14 = vcmp.eq.f32.partialorder %v708_v57, 8.507059e+37  ;;  %v1184_v57 = vld [vmem:[%s1812_s8] ss:$0 sm:$0xff] }
 0x529   : > { %v1210_v52 = vpop.eup %1209 }
 0x52a   : > { %v700_v53 = vmul.f32 %v1210_v52, %v698_v51  ;;  %vm705_vm11 = vweird.f32 %v1210_v52 }
 0x52b   : > { %vm706_vm13 = vmor %vm704_vm12, %vm705_vm11 }
 0x52c   : > { %v701_v54 = vsub.f32 1.0, %v700_v53 }
 0x52e   : > { %v702_v56 = vmul.f32 %v1210_v52, %v701_v54 }
 0x530   : > { %v703_v58 = vadd.f32 %v1210_v52, %v702_v56 }
 0x532   : > { %v707_v60 = vsel %vm706_vm13, %v1210_v52, %v703_v58 }
 0x533   : > { %v712_v61 = vsel %vm709_vm14, %v711_v59, %v707_v60 }
 0x534   : > { %v714_v62 = vperm.slane %v712_v61, 0  ;;  %v715_v1 = vperm.slane %v712_v61, 1 }
 0x536   : > { %v719_v63 = vmul.f32 %v1204_v35, %v714_v62  ;;  %v718_v0 = vmul.f32 %v1202_v34, %v714_v62  ;;  %v721_v2 = vmul.f32 %v1208_v37, %v715_v1  ;;  %v720_v3 = vmul.f32 %v1206_v36, %v715_v1 }
 0x538   : > { %733 = vperm.xlu0 %1179, %v719_v63   ;;  %728 = vperm.xlu1 %1180, %v718_v0  }
 0x540   : > { %743 = vperm.xlu0 %1179, %v721_v2   ;;  %738 = vperm.xlu1 %1180, %v720_v3  }
 0x548   : > { %774 = vrot.lane.b32.xlu1 %v1716_v40, %s1506_s28  ;;  %779 = vrot.lane.b32.xlu0 %v1704_v9, %s1506_s28  ;;  %v790_v9 = vld [vmem:[#allocation15 + $0x28] sm:$0xff] }
 0x549   : > { %815 = vmatpush.msra.mxu2 %v790_v9 }
 0x54b   : > { %816 = vmatpush.msra.mxu2 %v789_v15 }
 0x54d   : > { %817 = vmatpush.msra.mxu2 %v788_v16 }
 0x54f   : > { %818 = vmatpush.msra.mxu2 %v787_v19 }
 0x550   : > { %846 = vrot.lane.b32.xlu0 %v481_v29, %s1504_s20 }
 0x551   : > { %819 = vmatpush.msra.mxu2 %v786_v24 }
 0x553   : > { %820 = vmatpush.msra.mxu2 %v785_v27 }
 0x5aa   : > { %v734_v20 = vpop.permute.xlu0 %733  ;;  %v729_v21 = vpop.permute.xlu1 %728 }
 0x5ab   : > { %v747_v22 = vmul.f32 %v734_v20, %v723_v17  ;;  %v746_v23 = vmul.f32 %v729_v21, %v722_v18 }
 0x5ad   : > { %v751_v25 = vsel %vm491_vm2, %v747_v22, 0.0  ;;  %v750_v26 = vsel %vm491_vm2, %v746_v23, 0.0 }
 0x5ae   : > { %v752_v28 = vadd.f32 %v751_v25, %v750_v26 }
 0x5b0   : > { %v753_v30 = vrot.slane %v752_v28, 4 }
 0x5b2   : > { %v754_v34 = vadd.f32 %v753_v30, %v752_v28  ;;  %v744_v35 = vpop.permute.xlu0 %743  ;;  %v739_v36 = vpop.permute.xlu1 %738 }
 0x5b3   : > { %v749_v37 = vmul.f32 %v744_v35, %v725_v31  ;;  %v748_v38 = vmul.f32 %v739_v36, %v724_v32 }
 0x5b4   : > { %v755_v42 = vrot.slane %v754_v34, 2 }
 0x5b5   : > { %v760_v39 = vsel %vm491_vm2, %v749_v37, 0.0  ;;  %v759_v41 = vsel %vm491_vm2, %v748_v38, 0.0 }
 0x5b6   : > { %v761_v43 = vadd.f32 %v760_v39, %v759_v41  ;;  %v756_v45 = vadd.f32 %v755_v42, %v754_v34 }
 0x5b8   : > { %v762_v44 = vrot.slane %v761_v43, 4  ;;  %v757_v48 = vrot.slane %v756_v45, 1 }
 0x5ba   : > { %v763_v46 = vadd.f32 %v762_v44, %v761_v43  ;;  %v758_v51 = vadd.f32 %v757_v48, %v756_v45  ;;  %v780_v54 = vpop.permute.xlu0 %779  ;;  %v775_v55 = vpop.permute.xlu1 %774 }
 0x5bc   : > { %v764_v47 = vrot.slane %v763_v46, 2 }
 0x5be   : > { %v765_v49 = vadd.f32 %v764_v47, %v763_v46 }
 0x5c0   : > { %v766_v50 = vrot.slane %v765_v49, 1 }
 0x5c2   : > { %v767_v52 = vadd.f32 %v766_v50, %v765_v49  ;;  %v847_v13 = vpop.permute.xlu0 %846 }
 0x5c4   : > { %v770_v53 = vsel %vm648_vm9, %v767_v52, %v758_v51 }
 0x5c5   : > { %773 = vst.msk [vmem:[#allocation5] sm:$0x3] %vm772_vm15, %v770_v53 }
 0x5c6   : > { %778 = vst.msk [vmem:[#allocation5] sm:$0x3] %vm777_vm0, %v775_v55 }
 0x5c7   : > { %783 = vst.msk [vmem:[#allocation5] sm:$0x3] %vm782_vm1, %v780_v54 }
 0x5ce   : > { %v784_v56 = vld [vmem:[#allocation5] sm:$0x3] }
 0x5cf   : > { %821 = vmatmul.f32.vlgmr.msra.gmra.mxu2 %v784_v56 }
 0x652   : > { %v822_v58 = vpop.f32.mrf.mxu2 }
 0x653   : > { %v823_v59 = vadd.f32 %v1184_v57, %v822_v58 }
 0x655   : > { %1211 = vtanh.f32 %v823_v59  ;;  %v1054_v61 = vmul.f32 -1.442695, %v823_v59 }
 0x657   : > { %1213 = vpow2.f32 %v1054_v61 }
 0x65b   : > { %v1212_v60 = vpop.eup %1211 }
 0x65c   : > { %851 = vrot.lane.b32.xlu1 %v1212_v60, %s1503_s16 }
 0x65d   : > { %v1214_v62 = vpop.eup %1213 }
 0x65e   : > { %v828_v63 = vadd.f32 1.0, %v1214_v62 }
 0x660   : > { %1215 = vrcp.f32 %v828_v63  ;;  %v840_v5 = vand.u32 2147483648, %v828_v63  ;;  %vm834_vm3 = vweird.f32 %v828_v63  ;;  %v838_v6 = vand.u32 2147483647, %v828_v63 }
 0x662   : > { %v841_v8 = vor.u32 1.1754944e-38, %v840_v5  ;;  %vm839_vm5 = vcmp.eq.f32.partialorder %v838_v6, 8.507059e+37 }
 0x666   : > { %v1216_v0 = vpop.eup %1215 }
 0x667   : > { %v830_v1 = vmul.f32 %v1216_v0, %v828_v63  ;;  %vm835_vm2 = vweird.f32 %v1216_v0 }
 0x668   : > { %vm836_vm4 = vmor %vm834_vm3, %vm835_vm2 }
 0x669   : > { %v831_v2 = vsub.f32 1.0, %v830_v1 }
 0x66b   : > { %v832_v3 = vmul.f32 %v1216_v0, %v831_v2 }
 0x66d   : > { %v833_v4 = vadd.f32 %v1216_v0, %v832_v3 }
 0x66f   : > { %v837_v7 = vsel %vm836_vm4, %v1216_v0, %v833_v4 }
 0x670   : > { %v842_v10 = vsel %vm839_vm5, %v841_v8, %v837_v7 }
 0x671   : > { %v849_v14 = vmul.f32 %v847_v13, %v842_v10 }
 0x6ce   : > { %v852_v11 = vpop.permute.xlu1 %851 }
 0x6cf   : > { %v854_v12 = vmul.f32 %v852_v11, %v842_v10 }
 0x6d1   : > { %856 = vrot.lane.b32.xlu1 %v854_v12, %s1504_s20 }
 0x6d9   : > { %557 = vrot.lane.b32.xlu1 %v1712_v33, %s1506_s28 }
 0x6e1   : > { %876 = vrot.lane.b32.xlu1 %v1716_v40, %s1503_s16 }
 0x743   : > { %v857_v9 = vpop.permute.xlu1 %856 }
 0x744   : > { %v859_v15 = vadd.f32 %v857_v9, %v849_v14 }
 0x746   : > { %1217 = vtanh.f32 %v859_v15 }
 0x74b   : > { %v558_v16 = vpop.permute.xlu1 %557 }
 0x74c   : > { %v1218_v17 = vpop.eup %1217  ;;  %561 = vst.msk [vmem:[#allocation3] sm:$0x3] %vm560_vm6, %v558_v16 }
 0x74d   : > { %862 = vrot.lane.b32.xlu0 %v1218_v17, %s1503_s16  ;;  %s883_s16 = scalar_lea.sflag [#allocation8], %s1679_s4 }
 0x753   : > { %v877_v20 = vpop.permute.xlu1 %876 }
 0x755   : > { %867 = vrot.lane.b32.xlu0 %v859_v15, %s1506_s28  ;;  %s1419_s28 = scalar_lea.hbm %s1813_s9, 16 }
 0x7bf   : > { %v863_v33 = vpop.permute.xlu0 %862 }
 0x7c0   : > { %v865_v18 = vmul.f32 %v863_v33, %v842_v10 }
 0x7c2   : > { %872 = vrot.lane.b32.xlu2 %v865_v18, %s1504_s20  ;;  %s1413_s20 = sshra.s32 %s899_s23, 4  ;;  %s1414_s20 = int_to_ptr.hbm [resolvable:$true] %s1413_s20 }
 0x7c3   : > { %s1415_s12 = scalar_lea.hbm %s1414_s20, 2  ;;  %p1420_p9 = scmp.lt.s32.totalorder %s1414_s20, %s1813_s9 }
 0x7c4   : > { %p1416_p1 = scmp.ne.s32.totalorder %s1414_s20, %s1415_s12  ;;  %p1421_p10 = scmp.lt.s32.totalorder %s1419_s28, %s1415_s12 }
 0x7c6   : > { %p1417_p7 = pnand %p1416_p1, %p1657_p2  ;;  %p1422_p11 = por %p1421_p10, %p1420_p9 }
 0x7c7   : > { %v868_v40 = vpop.permute.xlu0 %867 }
 0x7c8   : > { %870 = vst.msk [vmem:[#allocation4] sm:$0x3] %vm560_vm6, %v868_v40  ;;  %p1418_p8 = pneg %p1417_p7 }
 0x7ca   : > { %p1423_p12 = pnand %p1422_p11, %p1418_p8 }
 0x81c   : > { %v873_v19 = vpop.permute.xlu2 %872 }
 0x81d   : > { %875 = vst.msk [vmem:[#allocation2] sm:$0x3] %vm560_vm6, %v873_v19 }
 0x81e   : > { %880 = vst.msk [vmem:[#allocation2] sm:$0x3] %vm879_vm7, %v877_v20 }
 0x81f   : > { %881 = vst.msk [vmem:[%s1701_s2] sm:$0x3] %vm560_vm6, %v873_v19 }
 0x820   : > { %1426 = shalt.err (!%p1423_p12)
}
 0x821   : > { %1081 = dma.vmem_to_hbm [thread:$0]  (%p1657_p2), %s897_s1, 32, %s899_s23, %s883_s16  }
 0x822 PF: > { %p1118_p13 = scmp.ge.s32.totalorder %s1493_s14, 2  ;;  %s910_s4 = sand.u32 1, %s1473_s30  }
 0x823   : > { %s911_s2 = scalar_lea.sflag [#allocation8], %s910_s4 }
 0x824   : > { %p1104_p0 = pnand %p1118_p13, %p1665_p5 }
 0x826   : > { %p1105_p4 = pneg %p1104_p0 }
 0x828   : > { %1468 = dma.done.wait (%p1105_p4), %s911_s2, 32  }
 0x829   : > { %1470 = vsyncadd (%p1105_p4), %s911_s2, 4294967264  ;;  %s28_s14 = sadd.s32 1, %s1493_s14   ;;  %s1831_s30 = smov %s1477_s10 }
 0x82a   : > { %p25_p6 = scmp.ge.s32.totalorder %s28_s14, 10   ;;  %s1832_s10 = smov %s1481_s11 }
 0x82b   : > { %s1833_s11 = smov %s1663_s22  ;;  %s1834_s12 = smov %s1489_s13 }
 0x82c   : > { %s1835_s13 = smov %s1837_s24  ;;  %27 = sbr.rel (!%p25_p6) target bundleno = 14 (0xe), region = 127 }
 0x831   :  { %917 = vsyncpa [#allocation7], 1 }
 0x832   :  { %919 = vsyncpa [#allocation7 + $0x1], 1 }
 0x833   :  { %920 = vsyncpa [#allocation10], 1 }
 0x834   :  { %921 = vsyncpa [#allocation13], 1 }
 0x835   :  { %922 = vsyncpa [#allocation16], 1 }
 0x836   :  { %923 = vsyncpa [#allocation8], 1 }
 0x837   :  { %925 = vsyncpa [#allocation8 + $0x1], 1 }

</bundles_post_ra>
